<compile_context>
chip_gen: v5e
topology: v5e:2x2
jax: 0.10.0
libtpu: 0.0.40
codegen_flags: <defaults>
</compile_context>

<pallas_src>
import jax
import jax.numpy as jnp
from jax.experimental import pallas as pl
from jax.experimental.pallas import tpu as pltpu

_LANES = 128
# 1024 rows x 128 lanes x 4 B = 512 KiB per block; with in+out double-buffering
# that is ~2 MiB VMEM — safe on v5e/v6e (128 MiB) and v7x (64 MiB).
_MAX_BLOCK_ROWS = 1024


def _copy_kernel(x_ref, o_ref):
    # Identity copy of one lane-dense tile (split [1,1,1] + cat == identity).
    o_ref[...] = x_ref[...]


def split_concat(v1: jax.Array) -> jax.Array:
    """Pallas implementation of Model.forward (split [1,1,1] on dim=1 + cat)."""
    N, C, H, W = v1.shape
    assert C == 3, "torch.split(v1, [1,1,1], dim=1) requires 3 channels"

    total = N * C * H * W
    nbytes = total * jnp.dtype(v1.dtype).itemsize
    # Pure memory traffic: tell XLA's scheduler so it can overlap neighbors.
    cost = pl.CostEstimate(flops=0, transcendentals=0, bytes_accessed=2 * nbytes)

    if total % _LANES == 0:
        # Lane-dense path: flatten to (rows, 128) so stores are full-lane vst.
        rows = total // _LANES
        if rows <= _MAX_BLOCK_ROWS:
            block_rows = rows            # one grid step; block == full array dims
        else:
            block_rows = _MAX_BLOCK_ROWS  # multiple of 8 -> valid tiling; edge masked

        flat = v1.reshape(rows, _LANES)
        grid = (pl.cdiv(rows, block_rows),)
        spec = pl.BlockSpec((block_rows, _LANES), lambda i: (i, 0))

        out = pl.pallas_call(
            _copy_kernel,
            out_shape=jax.ShapeDtypeStruct((rows, _LANES), v1.dtype),
            grid_spec=pl.GridSpec(grid=grid, in_specs=[spec], out_specs=spec),
            compiler_params=pltpu.CompilerParams(
                dimension_semantics=("parallel",)  # lets v7x shard across its 2 TCs
            ),
            cost_estimate=cost,
        )(flat)
        return out.reshape(N, C, H, W)

    # Fallback (total not a multiple of 128): copy the whole tensor as one block
    # (block_shape equal to the full array dims bypasses the (8,128) constraint).
    spec = pl.BlockSpec((N, C, H, W), lambda i: (0, 0, 0, 0))
    return pl.pallas_call(
        _copy_kernel,
        out_shape=jax.ShapeDtypeStruct((N, C, H, W), v1.dtype),
        grid_spec=pl.GridSpec(grid=(1,), in_specs=[spec], out_specs=spec),
        cost_estimate=cost,
    )(v1)


if __name__ == "__main__":
    key = jax.random.PRNGKey(0)
    # NCHW input: batch=2, channels=3 (required by split [1,1,1]), 16x16 spatial.
    x = jax.random.normal(key, (2, 3, 16, 16), dtype=jnp.float32)

    out = split_concat(x)
    out = jax.block_until_ready(out)

    # Reference: split [1,1,1] + concat on dim=1 is an identity mapping.
    assert out.shape == x.shape
    assert jnp.array_equal(out, x)

    print("KERNEL_OK")
</pallas_src>

<mosaic_0001>
module attributes {stable_mosaic.version = 11 : i64} {
  func.func @_copy_kernel(%arg0: i32, %arg1: memref<12x128xf32, #tpu.memory_space<vmem>>, %arg2: memref<12x128xf32, #tpu.memory_space<vmem>>) attributes {dimension_semantics = [#tpu.dimension_semantics<parallel>], iteration_bounds = array<i64: 1>, scalar_prefetch = 0 : i64, scratch_operands = 0 : i64, tpu.core_type = #tpu.core_type<tc>, window_params = [{transform_indices = @transform_0, window_bounds = array<i64: 12, 128>}, {transform_indices = @transform_1, window_bounds = array<i64: 12, 128>}]} {
    %c0 = arith.constant 0 : index
    %c0_0 = arith.constant 0 : index
    %0 = vector.load %arg1[%c0, %c0_0] : memref<12x128xf32, #tpu.memory_space<vmem>>, vector<12x128xf32>
    %c0_1 = arith.constant 0 : index
    %c0_2 = arith.constant 0 : index
    %1 = vector.load %arg2[%c0_1, %c0_2] : memref<12x128xf32, #tpu.memory_space<vmem>>, vector<12x128xf32>
    tpu.vector_store %arg2[%c0_1, %c0_2], %0 {strides = array<i32>} : memref<12x128xf32, #tpu.memory_space<vmem>>, vector<12x128xf32>,
    return
  }
  func.func @transform_0(%arg0: i32) -> (i32, i32) {
    %c0_i32 = arith.constant 0 : i32
    %c0_i32_0 = arith.constant 0 : i32
    return %arg0, %c0_i32 : i32, i32
  }
  func.func @transform_1(%arg0: i32) -> (i32, i32) {
    %c0_i32 = arith.constant 0 : i32
    %c0_i32_0 = arith.constant 0 : i32
    return %arg0, %c0_i32 : i32, i32
  }
}

</mosaic_0001>

<bundles_post_ra>
// kernel: tpu_custom_call.1
= control target key start
LH: loop header
LB: loop body
LE: loop exit
PB: predicated region body
PF: predicated region fallthrough
CT: control target
= control target key end

     0   :  { %6 = vsyncpa [#allocation3], 0  ;;  %s124_s0 = inlined_call_operand.hbm [shape: f32[12,128], index: 0, kind: input, shape index: {}]   ;;  %s125_s1 = inlined_call_operand.hbm [shape: f32[12,128], index: 1, kind: output, shape index: {}]  }
   0x1   :  { %7 = vsyncpa [#allocation4], 0  ;;  %s12_s8 = sshll.u32 %s124_s0, 4  ;;  %s104_s9 = smov [#allocation2]   ;;  %s13_s8 = int_to_ptr.hbm [resolvable:$true] %s12_s8 }
   0x2   :  { %s14_s10 = sshll.u32 %s104_s9, 4  ;;  %s105_s11 = smov 128   ;;  %s15_s10 = int_to_ptr.vmem [resolvable:$true] %s14_s10 }
   0x3   :  { %s106_s12 = smov 8  }
   0x4   :  { %20 = dma.hbm_to_vmem [thread:$0]  %s13_s8, 256, %s15_s10, [#allocation3], %s105_s11, %s105_s11, %s106_s12  }
   0x5   :  { %100 = dma.done.wait [#allocation3], 256  }
   0x6   :  { %101 = vsyncadd [#allocation3], 4294967040  ;;  %s107_s13 = smov [#allocation5]   ;;  %s35_s17 = sshll.u32 %s125_s1, 4  ;;  %v25_v0 = vld [vmem:[#allocation2] sm:$0xff]  ;;  %s36_s17 = int_to_ptr.hbm [resolvable:$true] %s35_s17 }
   0x7   :  { %s33_s14 = sshll.u32 %s107_s13, 4  ;;  %v26_v1 = vld [vmem:[#allocation2 + $0x8] sm:$0xf]  ;;  %27 = vst [vmem:[#allocation5] sm:$0xff] %v25_v0  ;;  %s34_s14 = int_to_ptr.vmem [resolvable:$true] %s33_s14 }
   0x8   :  { %28 = vst [vmem:[#allocation5 + $0x8] sm:$0xf] %v26_v1 }
   0x9   :  { %41 = dma.vmem_to_hbm [thread:$0]  %s34_s14, 256, %s36_s17, [#allocation4], %s105_s11, %s105_s11, %s106_s12  }
   0xa   :  { %102 = dma.done.wait [#allocation4], 256  }
   0xb   :  { %103 = vsyncadd [#allocation4], 4294967040 }
   0xc   :  { %46 = vsyncpa [#allocation3], 1 }
   0xd   :  { %47 = vsyncpa [#allocation4], 1 }

</bundles_post_ra>
